<compile_context>
chip_gen: v5e
topology: v5e:2x2
jax: 0.10.0
libtpu: 0.0.40
codegen_flags: <defaults>
</compile_context>

<pallas_src>
import jax
import jax.numpy as jnp
from jax.experimental import pallas as pl
from jax.experimental.pallas import tpu as pltpu

K_BITS = 4          # module-level K (activation quantization bits)
BN_EPS = 1e-5


# ----------------------------- math helpers (plain JAX glue) -----------------------------

def quantize_k(r, k):
    scale = 2.0 ** k - 1.0
    return jnp.round(scale * r) / scale


def dorefa_quant(w, k):
    """DoReFaQuant.forward"""
    t = jnp.tanh(w).astype(jnp.float32)
    return 2.0 * quantize_k(t / (2.0 * jnp.max(jnp.abs(t))) + 0.5, k) - 1.0


def _act_quant(x, alpha):
    """ActFn.forward: clamp to [0, alpha], quantize to 2^K-1 uniform levels."""
    lv = 2.0 ** K_BITS - 1.0
    scale = lv / alpha
    inv = alpha / lv
    return jnp.round(jnp.clip(x, 0.0, alpha) * scale) * inv


def _silu(y):
    return y * (1.0 / (1.0 + jnp.exp(-y)))


def bn_fold(cb):
    """Fold eval-mode BatchNorm2d into per-channel scale/bias, shape (1, C)."""
    s = cb["gamma"] / jnp.sqrt(cb["rv"] + BN_EPS)
    b = cb["beta"] - cb["rm"] * s
    return s.reshape(1, -1), b.reshape(1, -1)


def _block_diag(w, reps):
    """w: (Cin, Cout) -> block-diagonal (reps*Cin, reps*Cout) for the row layout."""
    cin, cout = w.shape
    eye = jnp.eye(reps, dtype=w.dtype)
    return jnp.einsum("pq,io->piqo", eye, w).reshape(reps * cin, reps * cout)


def _band_3x3(w_oihw, wp, wo):
    """3x3 conv weight (O, I, 3, 3) -> (3, wp*I, wo*O) banded matrices, one per ky.

    T_dy[(p*I + i), (w*O + o)] = w[o, i, dy, p - w]  for p - w in {0,1,2}, else 0,
    so that  out_row[h] = sum_dy  h1_padded_row[h + dy] @ T_dy  reproduces the
    zero-padded stride-1 3x3 cross-correlation.
    """
    o, i = w_oihw.shape[0], w_oihw.shape[1]
    mats = []
    for dy in range(3):
        t = jnp.zeros((wp, i, wo, o), w_oihw.dtype)
        for dx in range(3):
            shift = jnp.eye(wp, wo, k=-dx, dtype=w_oihw.dtype)     # [p,w]=1 iff p==w+dx
            t = t + jnp.einsum("pw,io->piwo", shift, w_oihw[:, :, dy, dx].T)
        mats.append(t.reshape(wp * i, wo * o))
    return jnp.stack(mats)


def _tile_cols(v, reps):
    """(1, C) per-channel vector -> (1, reps*C), channel-minor within each pixel."""
    return jnp.tile(v, (1, reps))


# ----------------------------------- Pallas kernel -----------------------------------

def _make_block_kernel(H, W, C1, C2, C3, has_proj):
    Hp, Wp = H + 2, W + 2

    def kernel(act_ref, xp_ref, x_ref,
               w1_ref, s1_ref, b1_ref,
               w2_ref, s2_ref, b2_ref,
               w3_ref, s3_ref, b3_ref,
               *rest):
        if has_proj:
            wsc_ref, ssc_ref, bsc_ref, o_ref, h1s_ref = rest
        else:
            o_ref, h1s_ref = rest

        # ------------- cv1 (1x1) -> BN -> SiLU -> ActFn(alpha1) -------------
        xp = xp_ref[0]                                            # (Hp, Wp*C1) f32
        h1 = jnp.dot(xp.astype(jnp.bfloat16), w1_ref[...],
                     preferred_element_type=jnp.float32)          # (Hp, Wp*C2)
        h1 = h1 * s1_ref[...] + b1_ref[...]
        h1 = h1 * (1.0 / (1.0 + jnp.exp(-h1)))                    # SiLU
        a1, sc1, inv1 = act_ref[0, 0], act_ref[0, 1], act_ref[0, 2]
        h1 = jnp.round(jnp.clip(h1, 0.0, a1) * sc1) * inv1        # PACT quant
        # cv2's zero padding applies to the cv1 *output*: zero the pad ring.
        rr = jax.lax.broadcasted_iota(jnp.int32, (Hp, Wp * C2), 0)
        cc = jax.lax.broadcasted_iota(jnp.int32, (Hp, Wp * C2), 1)
        interior = (rr >= 1) & (rr <= H) & (cc >= C2) & (cc < (Wp - 1) * C2)
        h1s_ref[...] = jnp.where(interior, h1, 0.0)               # stays in VMEM

        # ------------- cv2 (3x3 as 3 row-shifted banded matmuls) -> BN -> SiLU -------------
        acc = jnp.zeros((H, W * C2), jnp.float32)
        for dy in range(3):
            acc = acc + jnp.dot(h1s_ref[dy:dy + H, :].astype(jnp.bfloat16),
                                w2_ref[dy], preferred_element_type=jnp.float32)
        h2 = acc * s2_ref[...] + b2_ref[...]
        h2 = h2 * (1.0 / (1.0 + jnp.exp(-h2)))

        # ------------- cv3 (1x1) -> BN, then ReLU -------------
        h3 = jnp.dot(h2.astype(jnp.bfloat16), w3_ref[...],
                     preferred_element_type=jnp.float32)          # (H, W*C3)
        h3 = jnp.maximum(h3 * s3_ref[...] + b3_ref[...], 0.0)

        # ------------- shortcut + residual add + ActFn(alpha2) -------------
        x_in = x_ref[0]                                           # (H, W*C1) f32
        if has_proj:
            sc = jnp.dot(x_in.astype(jnp.bfloat16), wsc_ref[...],
                         preferred_element_type=jnp.float32)
            sc = sc * ssc_ref[...] + bsc_ref[...]
        else:
            sc = x_in                                             # identity (C1 == C3)
        y = h3 + sc
        a2, sc2, inv2 = act_ref[1, 0], act_ref[1, 1], act_ref[1, 2]
        o_ref[0] = jnp.round(jnp.clip(y, 0.0, a2) * sc2) * inv2

    return kernel


def _const_spec(shape):
    zeros = (0,) * len(shape)
    return pl.BlockSpec(shape, lambda n: zeros)


def _block_pallas_call(N, H, W, C1, C2, C3, has_proj):
    Hp, Wp = H + 2, W + 2
    kernel = _make_block_kernel(H, W, C1, C2, C3, has_proj)
    in_specs = [
        pl.BlockSpec((2, 3), lambda n: (0, 0), memory_space=pltpu.MemorySpace.SMEM),
        pl.BlockSpec((1, Hp, Wp * C1), lambda n: (n, 0, 0)),      # padded x rows
        pl.BlockSpec((1, H, W * C1), lambda n: (n, 0, 0)),        # x rows (shortcut)
        _const_spec((Wp * C1, Wp * C2)),                          # w1 block-diag
        _const_spec((1, Wp * C2)), _const_spec((1, Wp * C2)),
        _const_spec((3, Wp * C2, W * C2)),                        # w2 banded
        _const_spec((1, W * C2)), _const_spec((1, W * C2)),
        _const_spec((W * C2, W * C3)),                            # w3 block-diag
        _const_spec((1, W * C3)), _const_spec((1, W * C3)),
    ]
    if has_proj:
        in_specs += [_const_spec((W * C1, W * C3)),               # shortcut block-diag
                     _const_spec((1, W * C3)), _const_spec((1, W * C3))]
    return pl.pallas_call(
        kernel,
        out_shape=jax.ShapeDtypeStruct((N, H, W * C3), jnp.float32),
        grid=(N,),
        in_specs=in_specs,
        out_specs=pl.BlockSpec((1, H, W * C3), lambda n: (n, 0, 0)),
        scratch_shapes=[pltpu.VMEM((Hp, Wp * C2), jnp.float32)],
        compiler_params=pltpu.CompilerParams(dimension_semantics=("parallel",)),
    )


# ------------------------------ parameter init (deterministic) ------------------------------

def init_conv_bn(key, cin, cout, k):
    w = jax.random.normal(key, (cout, cin, k, k), jnp.float32) * 0.5
    # fresh BatchNorm2d: gamma=1, beta=0, running_mean=0, running_var=1
    return {"w": w,
            "gamma": jnp.ones((cout,), jnp.float32),
            "beta": jnp.zeros((cout,), jnp.float32),
            "rm": jnp.zeros((cout,), jnp.float32),
            "rv": jnp.ones((cout,), jnp.float32)}


def init_block(key, c1, c2, s, e):
    c3 = e * c2
    k1, k2, k3, k4 = jax.random.split(key, 4)
    p = {"s": s, "c1": c1, "c2": c2, "c3": c3,
         "cv1": init_conv_bn(k1, c1, c2, 1),
         "cv2": init_conv_bn(k2, c2, c2, 3),
         "cv3": init_conv_bn(k3, c2, c3, 1),
         "alpha1": jnp.array(10.0, jnp.float32),
         "alpha2": jnp.array(10.0, jnp.float32)}
    p["shortcut"] = init_conv_bn(k4, c1, c3, 1) if (s != 1 or c1 != c3) else None
    return p


def init_layer(key, c1, c2, s=1, n=1, e=4):
    keys = jax.random.split(key, n)
    blocks = [init_block(keys[0], c1, c2, s, e)]
    for i in range(1, n):
        blocks.append(init_block(keys[i], e * c2, c2, 1, e))
    return {"blocks": blocks, "alpha1": jnp.array(10.0, jnp.float32)}  # layer alpha1 unused (is_first=False)


# --------------------------------- forward (Pallas path) ---------------------------------

def resnet_block_forward(x_nhwc, p):
    N, H, W, C1 = x_nhwc.shape
    C2, C3, s = p["c2"], p["c3"], p["s"]
    Hp, Wp = H + 2, W + 2
    has_proj = p["shortcut"] is not None

    # DoReFa-quantized weights -> bf16 block-diag / banded matrices for the row layout
    w1 = dorefa_quant(p["cv1"]["w"], K_BITS)[:, :, 0, 0].T                # (C1, C2)
    w2 = dorefa_quant(p["cv2"]["w"], K_BITS)                              # (C2, C2, 3, 3)
    w3 = dorefa_quant(p["cv3"]["w"], K_BITS)[:, :, 0, 0].T                # (C2, C3)
    w1bd = _block_diag(w1, Wp).astype(jnp.bfloat16)
    w2bd = _band_3x3(w2, Wp, W).astype(jnp.bfloat16)
    w3bd = _block_diag(w3, W).astype(jnp.bfloat16)
    s1, b1 = bn_fold(p["cv1"])
    s2, b2 = bn_fold(p["cv2"])
    s3, b3 = bn_fold(p["cv3"])
    s1t, b1t = _tile_cols(s1, Wp), _tile_cols(b1, Wp)
    s2t, b2t = _tile_cols(s2, W), _tile_cols(b2, W)
    s3t, b3t = _tile_cols(s3, W), _tile_cols(b3, W)

    # ActFn constants [alpha, scale, 1/scale] for alpha1 / alpha2 (SMEM scalars)
    lv = 2.0 ** K_BITS - 1.0
    act = jnp.stack([
        jnp.stack([p["alpha1"], lv / p["alpha1"], p["alpha1"] / lv]),
        jnp.stack([p["alpha2"], lv / p["alpha2"], p["alpha2"] / lv]),
    ]).astype(jnp.float32)                                                # (2, 3)

    # channels-last rows (row, W*C); padded copy feeds cv1/cv2, unpadded feeds the shortcut
    x_rows = x_nhwc.reshape(N, H, W * C1)
    xp_rows = jnp.pad(x_nhwc, ((0, 0), (1, 1), (1, 1), (0, 0))).reshape(N, Hp, Wp * C1)

    args = [act, xp_rows, x_rows, w1bd, s1t, b1t, w2bd, s2t, b2t, w3bd, s3t, b3t]
    if has_proj:
        wsc = dorefa_quant(p["shortcut"]["w"], 8)[:, :, 0, 0].T           # bitwidth=8
        ssc, bsc = bn_fold(p["shortcut"])
        args += [_block_diag(wsc, W).astype(jnp.bfloat16),
                 _tile_cols(ssc, W), _tile_cols(bsc, W)]

    out = _block_pallas_call(N, H, W, C1, C2, C3, has_proj)(*args)
    out = out.reshape(N, H, W, C3)
    if s != 1:
        # stride-s 1x1 / 3x3(pad=1) convs == stride-1 convs sampled at (::s, ::s)
        out = out[:, ::s, ::s, :]
    return out


def resnet_layer_forward(x_nchw, layer_params):
    x = jnp.transpose(x_nchw, (0, 2, 3, 1)).astype(jnp.float32)   # NCHW -> NHWC
    for bp in layer_params["blocks"]:
        x = resnet_block_forward(x, bp)
    return jnp.transpose(x, (0, 3, 1, 2))                         # back to NCHW


# --------------------------------- pure-JAX reference ---------------------------------

def _ref_conv_bn(x_nchw, cb, k_bits, stride, pad, act):
    # bf16 conv operands with f32 accumulation (mirrors the module's autocast fp16 forward
    # and the Pallas kernel's bf16 matmul operands)
    w = dorefa_quant(cb["w"], k_bits).astype(jnp.bfloat16)
    y = jax.lax.conv_general_dilated(
        x_nchw.astype(jnp.bfloat16), w, (stride, stride), [(pad, pad), (pad, pad)],
        dimension_numbers=("NCHW", "OIHW", "NCHW"),
        preferred_element_type=jnp.float32)
    s = (cb["gamma"] / jnp.sqrt(cb["rv"] + BN_EPS)).reshape(1, -1, 1, 1)
    b = (cb["beta"] - cb["rm"] * cb["gamma"] / jnp.sqrt(cb["rv"] + BN_EPS)).reshape(1, -1, 1, 1)
    y = y * s + b
    return _silu(y) if act else y


def _ref_block(x, p):
    out = _act_quant(_ref_conv_bn(x, p["cv1"], K_BITS, 1, 0, True), p["alpha1"])
    out = _ref_conv_bn(out, p["cv2"], K_BITS, p["s"], 1, True)
    out = jnp.maximum(_ref_conv_bn(out, p["cv3"], K_BITS, 1, 0, False), 0.0)
    sc = _ref_conv_bn(x, p["shortcut"], 8, p["s"], 0, False) if p["shortcut"] is not None else x
    return _act_quant(out + sc, p["alpha2"])


def ref_layer_forward(x_nchw, layer_params):
    x = x_nchw.astype(jnp.float32)
    for p in layer_params["blocks"]:
        x = _ref_block(x, p)
    return x


# ----------------------------------------- main -----------------------------------------

if __name__ == "__main__":
    key = jax.random.PRNGKey(0)
    kx, kp = jax.random.split(key)

    # ResNetLayer_with_bitwidth(c1=4, c2=4, s=1, is_first=False, n=2, e=4)
    c1, c2, s, n, e = 4, 4, 1, 2, 4
    x = jax.random.normal(kx, (2, c1, 16, 16), jnp.float32)        # NCHW like PyTorch
    params = init_layer(kp, c1, c2, s=s, n=n, e=e)

    out = resnet_layer_forward(x, params)
    out = jax.block_until_ready(out)

    ref = ref_layer_forward(x, params)
    assert out.shape == (2, e * c2, 16, 16), out.shape
    diff = jnp.abs(out - ref)
    # PACT round() near a level boundary can flip under a different accumulation
    # order and locally shift a few outputs by a full quant step, so check the
    # bulk of the error distribution rather than the max.
    assert float(jnp.median(diff)) < 1e-3, float(jnp.median(diff))
    frac_bad = float(jnp.mean((diff > 1e-2).astype(jnp.float32)))
    assert frac_bad < 0.08, (frac_bad, float(jnp.max(diff)))

    print("KERNEL_OK")
</pallas_src>

<mosaic_0001>
module attributes {stable_mosaic.version = 11 : i64} {
  func.func @kernel(%arg0: i32, %arg1: memref<2x3xf32, #tpu.memory_space<smem>>, %arg2: memref<1x18x72xf32, #tpu.memory_space<vmem>>, %arg3: memref<1x16x64xf32, #tpu.memory_space<vmem>>, %arg4: memref<72x72xbf16, #tpu.memory_space<vmem>>, %arg5: memref<1x72xf32, #tpu.memory_space<vmem>>, %arg6: memref<1x72xf32, #tpu.memory_space<vmem>>, %arg7: memref<3x72x64xbf16, #tpu.memory_space<vmem>>, %arg8: memref<1x64xf32, #tpu.memory_space<vmem>>, %arg9: memref<1x64xf32, #tpu.memory_space<vmem>>, %arg10: memref<64x256xbf16, #tpu.memory_space<vmem>>, %arg11: memref<1x256xf32, #tpu.memory_space<vmem>>, %arg12: memref<1x256xf32, #tpu.memory_space<vmem>>, %arg13: memref<64x256xbf16, #tpu.memory_space<vmem>>, %arg14: memref<1x256xf32, #tpu.memory_space<vmem>>, %arg15: memref<1x256xf32, #tpu.memory_space<vmem>>, %arg16: memref<1x16x256xf32, #tpu.memory_space<vmem>>, %arg17: memref<18x72xf32, #tpu.memory_space<vmem>>) attributes {dimension_semantics = [#tpu.dimension_semantics<parallel>], iteration_bounds = array<i64: 2>, scalar_prefetch = 0 : i64, scratch_operands = 1 : i64, tpu.core_type = #tpu.core_type<tc>, window_params = [{transform_indices = @transform_0, window_bounds = array<i64: 2, 3>}, {transform_indices = @transform_1, window_bounds = array<i64: 1, 18, 72>}, {transform_indices = @transform_2, window_bounds = array<i64: 1, 16, 64>}, {pipeline_mode = #tpu.pipeline_mode<synchronous>, transform_indices = @transform_3, window_bounds = array<i64: 72, 72>}, {pipeline_mode = #tpu.pipeline_mode<synchronous>, transform_indices = @transform_4, window_bounds = array<i64: 1, 72>}, {pipeline_mode = #tpu.pipeline_mode<synchronous>, transform_indices = @transform_5, window_bounds = array<i64: 1, 72>}, {pipeline_mode = #tpu.pipeline_mode<synchronous>, transform_indices = @transform_6, window_bounds = array<i64: 3, 72, 64>}, {pipeline_mode = #tpu.pipeline_mode<synchronous>, transform_indices = @transform_7, window_bounds = array<i64: 1, 64>}, {pipeline_mode = #tpu.pipeline_mode<synchronous>, transform_indices = @transform_8, window_bounds = array<i64: 1, 64>}, {pipeline_mode = #tpu.pipeline_mode<synchronous>, transform_indices = @transform_9, window_bounds = array<i64: 64, 256>}, {pipeline_mode = #tpu.pipeline_mode<synchronous>, transform_indices = @transform_10, window_bounds = array<i64: 1, 256>}, {pipeline_mode = #tpu.pipeline_mode<synchronous>, transform_indices = @transform_11, window_bounds = array<i64: 1, 256>}, {pipeline_mode = #tpu.pipeline_mode<synchronous>, transform_indices = @transform_12, window_bounds = array<i64: 64, 256>}, {pipeline_mode = #tpu.pipeline_mode<synchronous>, transform_indices = @transform_13, window_bounds = array<i64: 1, 256>}, {pipeline_mode = #tpu.pipeline_mode<synchronous>, transform_indices = @transform_14, window_bounds = array<i64: 1, 256>}, {transform_indices = @transform_15, window_bounds = array<i64: 1, 16, 256>}]} {
    %c0 = arith.constant 0 : index
    %c0_0 = arith.constant 0 : index
    %c0_1 = arith.constant 0 : index
    %0 = vector.load %arg2[%c0, %c0_0, %c0_1] : memref<1x18x72xf32, #tpu.memory_space<vmem>>, vector<1x18x72xf32>
    %1 = vector.shape_cast %0 : vector<1x18x72xf32> to vector<18x72xf32>
    %2 = arith.truncf %1 : vector<18x72xf32> to vector<18x72xbf16>
    %c0_2 = arith.constant 0 : index
    %c0_3 = arith.constant 0 : index
    %3 = vector.load %arg4[%c0_2, %c0_3] : memref<72x72xbf16, #tpu.memory_space<vmem>>, vector<72x72xbf16>
    %cst = arith.constant dense<0.000000e+00> : vector<18x72xf32>
    %4 = tpu.matmul %2, %3, %cst {dimension_numbers = #tpu.dot_dimension_numbers<[1], [0], [0], [1], [0, 0, 1, 1], [], []>} : vector<18x72xbf16>, vector<72x72xbf16>, vector<18x72xf32> -> vector<18x72xf32>
    %c0_4 = arith.constant 0 : index
    %c0_5 = arith.constant 0 : index
    %5 = vector.load %arg5[%c0_4, %c0_5] : memref<1x72xf32, #tpu.memory_space<vmem>>, vector<1x72xf32>
    %6 = vector.broadcast %5 : vector<1x72xf32> to vector<18x72xf32>
    %7 = arith.mulf %4, %6 : vector<18x72xf32>
    %c0_6 = arith.constant 0 : index
    %c0_7 = arith.constant 0 : index
    %8 = vector.load %arg6[%c0_6, %c0_7] : memref<1x72xf32, #tpu.memory_space<vmem>>, vector<1x72xf32>
    %9 = vector.broadcast %8 : vector<1x72xf32> to vector<18x72xf32>
    %10 = arith.addf %7, %9 : vector<18x72xf32>
    %cst_8 = arith.constant 0.000000e+00 : f32
    %11 = vector.broadcast %cst_8 : f32 to vector<18x72xf32>
    %12 = arith.subf %11, %10 : vector<18x72xf32>
    %13 = math.exp %12 : vector<18x72xf32>
    %cst_9 = arith.constant 1.000000e+00 : f32
    %14 = vector.broadcast %cst_9 : f32 to vector<18x72xf32>
    %15 = arith.addf %14, %13 : vector<18x72xf32>
    %cst_10 = arith.constant 1.000000e+00 : f32
    %16 = vector.broadcast %cst_10 : f32 to vector<18x72xf32>
    %17 = arith.divf %16, %15 : vector<18x72xf32>
    %18 = arith.mulf %10, %17 : vector<18x72xf32>
    %c0_11 = arith.constant 0 : index
    %c0_12 = arith.constant 0 : index
    %19 = memref.load %arg1[%c0_11, %c0_12] : memref<2x3xf32, #tpu.memory_space<smem>>
    %c0_13 = arith.constant 0 : index
    %c1 = arith.constant 1 : index
    %20 = memref.load %arg1[%c0_13, %c1] : memref<2x3xf32, #tpu.memory_space<smem>>
    %c0_14 = arith.constant 0 : index
    %c2 = arith.constant 2 : index
    %21 = memref.load %arg1[%c0_14, %c2] : memref<2x3xf32, #tpu.memory_space<smem>>
    %cst_15 = arith.constant 0.000000e+00 : f32
    %22 = vector.broadcast %cst_15 : f32 to vector<18x72xf32>
    %23 = arith.maximumf %22, %18 : vector<18x72xf32>
    %24 = vector.broadcast %19 : f32 to vector<18x72xf32>
    %25 = arith.minimumf %24, %23 : vector<18x72xf32>
    %26 = vector.broadcast %20 : f32 to vector<18x72xf32>
    %27 = arith.mulf %25, %26 : vector<18x72xf32>
    %28 = math.roundeven %27 : vector<18x72xf32>
    %29 = vector.broadcast %21 : f32 to vector<18x72xf32>
    %30 = arith.mulf %28, %29 : vector<18x72xf32>
    %31 = tpu.iota {dimensions = array<i32: 0>} : vector<18x72xi32>
    %32 = tpu.iota {dimensions = array<i32: 1>} : vector<18x72xi32>
    %c1_i32 = arith.constant 1 : i32
    %33 = vector.broadcast %c1_i32 : i32 to vector<18x72xi32>
    %34 = arith.cmpi sge, %31, %33 : vector<18x72xi32>
    %c16_i32 = arith.constant 16 : i32
    %35 = vector.broadcast %c16_i32 : i32 to vector<18x72xi32>
    %36 = arith.cmpi sle, %31, %35 : vector<18x72xi32>
    %37 = arith.andi %34, %36 : vector<18x72xi1>
    %c4_i32 = arith.constant 4 : i32
    %38 = vector.broadcast %c4_i32 : i32 to vector<18x72xi32>
    %39 = arith.cmpi sge, %32, %38 : vector<18x72xi32>
    %40 = arith.andi %37, %39 : vector<18x72xi1>
    %c68_i32 = arith.constant 68 : i32
    %41 = vector.broadcast %c68_i32 : i32 to vector<18x72xi32>
    %42 = arith.cmpi slt, %32, %41 : vector<18x72xi32>
    %43 = arith.andi %40, %42 : vector<18x72xi1>
    %cst_16 = arith.constant 0.000000e+00 : f32
    %44 = vector.broadcast %cst_16 : f32 to vector<18x72xf32>
    %45 = arith.select %43, %30, %44 : vector<18x72xi1>, vector<18x72xf32>
    %c0_17 = arith.constant 0 : index
    %c0_18 = arith.constant 0 : index
    %46 = vector.load %arg17[%c0_17, %c0_18] : memref<18x72xf32, #tpu.memory_space<vmem>>, vector<18x72xf32>
    tpu.vector_store %arg17[%c0_17, %c0_18], %45 {strides = array<i32>} : memref<18x72xf32, #tpu.memory_space<vmem>>, vector<18x72xf32>,
    %cst_19 = arith.constant 0.000000e+00 : f32
    %47 = vector.broadcast %cst_19 : f32 to vector<16x64xf32>
    %c0_20 = arith.constant 0 : index
    %c0_21 = arith.constant 0 : index
    %48 = vector.load %arg17[%c0_20, %c0_21] : memref<18x72xf32, #tpu.memory_space<vmem>>, vector<16x72xf32>
    %49 = arith.truncf %48 : vector<16x72xf32> to vector<16x72xbf16>
    %c0_22 = arith.constant 0 : index
    %c0_23 = arith.constant 0 : index
    %c0_24 = arith.constant 0 : index
    %50 = vector.load %arg7[%c0_22, %c0_23, %c0_24] : memref<3x72x64xbf16, #tpu.memory_space<vmem>>, vector<1x72x64xbf16>
    %51 = vector.shape_cast %50 : vector<1x72x64xbf16> to vector<72x64xbf16>
    %cst_25 = arith.constant dense<0.000000e+00> : vector<16x64xf32>
    %52 = tpu.matmul %49, %51, %cst_25 {dimension_numbers = #tpu.dot_dimension_numbers<[1], [0], [0], [1], [0, 0, 1, 1], [], []>} : vector<16x72xbf16>, vector<72x64xbf16>, vector<16x64xf32> -> vector<16x64xf32>
    %53 = arith.addf %47, %52 : vector<16x64xf32>
    %c1_26 = arith.constant 1 : index
    %c0_27 = arith.constant 0 : index
    %54 = vector.load %arg17[%c1_26, %c0_27] : memref<18x72xf32, #tpu.memory_space<vmem>>, vector<16x72xf32>
    %55 = arith.truncf %54 : vector<16x72xf32> to vector<16x72xbf16>
    %c1_28 = arith.constant 1 : index
    %c0_29 = arith.constant 0 : index
    %c0_30 = arith.constant 0 : index
    %56 = vector.load %arg7[%c1_28, %c0_29, %c0_30] : memref<3x72x64xbf16, #tpu.memory_space<vmem>>, vector<1x72x64xbf16>
    %57 = vector.shape_cast %56 : vector<1x72x64xbf16> to vector<72x64xbf16>
    %cst_31 = arith.constant dense<0.000000e+00> : vector<16x64xf32>
    %58 = tpu.matmul %55, %57, %cst_31 {dimension_numbers = #tpu.dot_dimension_numbers<[1], [0], [0], [1], [0, 0, 1, 1], [], []>} : vector<16x72xbf16>, vector<72x64xbf16>, vector<16x64xf32> -> vector<16x64xf32>
    %59 = arith.addf %53, %58 : vector<16x64xf32>
    %c2_32 = arith.constant 2 : index
    %c0_33 = arith.constant 0 : index
    %60 = vector.load %arg17[%c2_32, %c0_33] : memref<18x72xf32, #tpu.memory_space<vmem>>, vector<16x72xf32>
    %61 = arith.truncf %60 : vector<16x72xf32> to vector<16x72xbf16>
    %c2_34 = arith.constant 2 : index
    %c0_35 = arith.constant 0 : index
    %c0_36 = arith.constant 0 : index
    %62 = vector.load %arg7[%c2_34, %c0_35, %c0_36] : memref<3x72x64xbf16, #tpu.memory_space<vmem>>, vector<1x72x64xbf16>
    %63 = vector.shape_cast %62 : vector<1x72x64xbf16> to vector<72x64xbf16>
    %cst_37 = arith.constant dense<0.000000e+00> : vector<16x64xf32>
    %64 = tpu.matmul %61, %63, %cst_37 {dimension_numbers = #tpu.dot_dimension_numbers<[1], [0], [0], [1], [0, 0, 1, 1], [], []>} : vector<16x72xbf16>, vector<72x64xbf16>, vector<16x64xf32> -> vector<16x64xf32>
    %65 = arith.addf %59, %64 : vector<16x64xf32>
    %c0_38 = arith.constant 0 : index
    %c0_39 = arith.constant 0 : index
    %66 = vector.load %arg8[%c0_38, %c0_39] : memref<1x64xf32, #tpu.memory_space<vmem>>, vector<1x64xf32>
    %67 = vector.broadcast %66 : vector<1x64xf32> to vector<16x64xf32>
    %68 = arith.mulf %65, %67 : vector<16x64xf32>
    %c0_40 = arith.constant 0 : index
    %c0_41 = arith.constant 0 : index
    %69 = vector.load %arg9[%c0_40, %c0_41] : memref<1x64xf32, #tpu.memory_space<vmem>>, vector<1x64xf32>
    %70 = vector.broadcast %69 : vector<1x64xf32> to vector<16x64xf32>
    %71 = arith.addf %68, %70 : vector<16x64xf32>
    %cst_42 = arith.constant 0.000000e+00 : f32
    %72 = vector.broadcast %cst_42 : f32 to vector<16x64xf32>
    %73 = arith.subf %72, %71 : vector<16x64xf32>
    %74 = math.exp %73 : vector<16x64xf32>
    %cst_43 = arith.constant 1.000000e+00 : f32
    %75 = vector.broadcast %cst_43 : f32 to vector<16x64xf32>
    %76 = arith.addf %75, %74 : vector<16x64xf32>
    %cst_44 = arith.constant 1.000000e+00 : f32
    %77 = vector.broadcast %cst_44 : f32 to vector<16x64xf32>
    %78 = arith.divf %77, %76 : vector<16x64xf32>
    %79 = arith.mulf %71, %78 : vector<16x64xf32>
    %80 = arith.truncf %79 : vector<16x64xf32> to vector<16x64xbf16>
    %c0_45 = arith.constant 0 : index
    %c0_46 = arith.constant 0 : index
    %81 = vector.load %arg10[%c0_45, %c0_46] : memref<64x256xbf16, #tpu.memory_space<vmem>>, vector<64x256xbf16>
    %cst_47 = arith.constant dense<0.000000e+00> : vector<16x256xf32>
    %82 = tpu.matmul %80, %81, %cst_47 {dimension_numbers = #tpu.dot_dimension_numbers<[1], [0], [0], [1], [0, 0, 1, 1], [], []>} : vector<16x64xbf16>, vector<64x256xbf16>, vector<16x256xf32> -> vector<16x256xf32>
    %c0_48 = arith.constant 0 : index
    %c0_49 = arith.constant 0 : index
    %83 = vector.load %arg11[%c0_48, %c0_49] : memref<1x256xf32, #tpu.memory_space<vmem>>, vector<1x256xf32>
    %84 = vector.broadcast %83 : vector<1x256xf32> to vector<16x256xf32>
    %85 = arith.mulf %82, %84 : vector<16x256xf32>
    %c0_50 = arith.constant 0 : index
    %c0_51 = arith.constant 0 : index
    %86 = vector.load %arg12[%c0_50, %c0_51] : memref<1x256xf32, #tpu.memory_space<vmem>>, vector<1x256xf32>
    %87 = vector.broadcast %86 : vector<1x256xf32> to vector<16x256xf32>
    %88 = arith.addf %85, %87 : vector<16x256xf32>
    %cst_52 = arith.constant 0.000000e+00 : f32
    %89 = vector.broadcast %cst_52 : f32 to vector<16x256xf32>
    %90 = arith.maximumf %88, %89 : vector<16x256xf32>
    %c0_53 = arith.constant 0 : index
    %c0_54 = arith.constant 0 : index
    %c0_55 = arith.constant 0 : index
    %91 = vector.load %arg3[%c0_53, %c0_54, %c0_55] : memref<1x16x64xf32, #tpu.memory_space<vmem>>, vector<1x16x64xf32>
    %92 = vector.shape_cast %91 : vector<1x16x64xf32> to vector<16x64xf32>
    %93 = arith.truncf %92 : vector<16x64xf32> to vector<16x64xbf16>
    %c0_56 = arith.constant 0 : index
    %c0_57 = arith.constant 0 : index
    %94 = vector.load %arg13[%c0_56, %c0_57] : memref<64x256xbf16, #tpu.memory_space<vmem>>, vector<64x256xbf16>
    %cst_58 = arith.constant dense<0.000000e+00> : vector<16x256xf32>
    %95 = tpu.matmul %93, %94, %cst_58 {dimension_numbers = #tpu.dot_dimension_numbers<[1], [0], [0], [1], [0, 0, 1, 1], [], []>} : vector<16x64xbf16>, vector<64x256xbf16>, vector<16x256xf32> -> vector<16x256xf32>
    %c0_59 = arith.constant 0 : index
    %c0_60 = arith.constant 0 : index
    %96 = vector.load %arg14[%c0_59, %c0_60] : memref<1x256xf32, #tpu.memory_space<vmem>>, vector<1x256xf32>
    %97 = vector.broadcast %96 : vector<1x256xf32> to vector<16x256xf32>
    %98 = arith.mulf %95, %97 : vector<16x256xf32>
    %c0_61 = arith.constant 0 : index
    %c0_62 = arith.constant 0 : index
    %99 = vector.load %arg15[%c0_61, %c0_62] : memref<1x256xf32, #tpu.memory_space<vmem>>, vector<1x256xf32>
    %100 = vector.broadcast %99 : vector<1x256xf32> to vector<16x256xf32>
    %101 = arith.addf %98, %100 : vector<16x256xf32>
    %102 = arith.addf %90, %101 : vector<16x256xf32>
    %c1_63 = arith.constant 1 : index
    %c0_64 = arith.constant 0 : index
    %103 = memref.load %arg1[%c1_63, %c0_64] : memref<2x3xf32, #tpu.memory_space<smem>>
    %c1_65 = arith.constant 1 : index
    %c1_66 = arith.constant 1 : index
    %104 = memref.load %arg1[%c1_65, %c1_66] : memref<2x3xf32, #tpu.memory_space<smem>>
    %c1_67 = arith.constant 1 : index
    %c2_68 = arith.constant 2 : index
    %105 = memref.load %arg1[%c1_67, %c2_68] : memref<2x3xf32, #tpu.memory_space<smem>>
    %cst_69 = arith.constant 0.000000e+00 : f32
    %106 = vector.broadcast %cst_69 : f32 to vector<16x256xf32>
    %107 = arith.maximumf %106, %102 : vector<16x256xf32>
    %108 = vector.broadcast %103 : f32 to vector<16x256xf32>
    %109 = arith.minimumf %108, %107 : vector<16x256xf32>
    %110 = vector.broadcast %104 : f32 to vector<16x256xf32>
    %111 = arith.mulf %109, %110 : vector<16x256xf32>
    %112 = math.roundeven %111 : vector<16x256xf32>
    %113 = vector.broadcast %105 : f32 to vector<16x256xf32>
    %114 = arith.mulf %112, %113 : vector<16x256xf32>
    %c0_70 = arith.constant 0 : index
    %c0_71 = arith.constant 0 : index
    %c0_72 = arith.constant 0 : index
    %115 = vector.load %arg16[%c0_70, %c0_71, %c0_72] : memref<1x16x256xf32, #tpu.memory_space<vmem>>, vector<1x16x256xf32>
    %116 = vector.shape_cast %115 : vector<1x16x256xf32> to vector<16x256xf32>
    %117 = vector.shape_cast %114 : vector<16x256xf32> to vector<1x16x256xf32>
    tpu.vector_store %arg16[%c0_70, %c0_71, %c0_72], %117 {strides = array<i32>} : memref<1x16x256xf32, #tpu.memory_space<vmem>>, vector<1x16x256xf32>,
    return
  }
  func.func @transform_0(%arg0: i32) -> (i32, i32) {
    %c0_i32 = arith.constant 0 : i32
    %c0_i32_0 = arith.constant 0 : i32
    %c0_i32_1 = arith.constant 0 : i32
    return %c0_i32, %c0_i32_0 : i32, i32
  }
  func.func @transform_1(%arg0: i32) -> (i32, i32, i32) {
    %c0_i32 = arith.constant 0 : i32
    %c0_i32_0 = arith.constant 0 : i32
    %c0_i32_1 = arith.constant 0 : i32
    return %arg0, %c0_i32, %c0_i32_0 : i32, i32, i32
  }
  func.func @transform_2(%arg0: i32) -> (i32, i32, i32) {
    %c0_i32 = arith.constant 0 : i32
    %c0_i32_0 = arith.constant 0 : i32
    %c0_i32_1 = arith.constant 0 : i32
    return %arg0, %c0_i32, %c0_i32_0 : i32, i32, i32
  }
  func.func @transform_3(%arg0: i32) -> (i32, i32) {
    %c0_i32 = arith.constant 0 : i32
    %c0_i32_0 = arith.constant 0 : i32
    %c0_i32_1 = arith.constant 0 : i32
    return %c0_i32, %c0_i32_0 : i32, i32
  }
  func.func @transform_4(%arg0: i32) -> (i32, i32) {
    %c0_i32 = arith.constant 0 : i32
    %c0_i32_0 = arith.constant 0 : i32
    %c0_i32_1 = arith.constant 0 : i32
    return %c0_i32, %c0_i32_0 : i32, i32
  }
  func.func @transform_5(%arg0: i32) -> (i32, i32) {
    %c0_i32 = arith.constant 0 : i32
    %c0_i32_0 = arith.constant 0 : i32
    %c0_i32_1 = arith.constant 0 : i32
    return %c0_i32, %c0_i32_0 : i32, i32
  }
  func.func @transform_6(%arg0: i32) -> (i32, i32, i32) {
    %c0_i32 = arith.constant 0 : i32
    %c0_i32_0 = arith.constant 0 : i32
    %c0_i32_1 = arith.constant 0 : i32
    %c0_i32_2 = arith.constant 0 : i32
    return %c0_i32, %c0_i32_0, %c0_i32_1 : i32, i32, i32
  }
  func.func @transform_7(%arg0: i32) -> (i32, i32) {
    %c0_i32 = arith.constant 0 : i32
    %c0_i32_0 = arith.constant 0 : i32
    %c0_i32_1 = arith.constant 0 : i32
    return %c0_i32, %c0_i32_0 : i32, i32
  }
  func.func @transform_8(%arg0: i32) -> (i32, i32) {
    %c0_i32 = arith.constant 0 : i32
    %c0_i32_0 = arith.constant 0 : i32
    %c0_i32_1 = arith.constant 0 : i32
    return %c0_i32, %c0_i32_0 : i32, i32
  }
  func.func @transform_9(%arg0: i32) -> (i32, i32) {
    %c0_i32 = arith.constant 0 : i32
    %c0_i32_0 = arith.constant 0 : i32
    %c0_i32_1 = arith.constant 0 : i32
    return %c0_i32, %c0_i32_0 : i32, i32
  }
  func.func @transform_10(%arg0: i32) -> (i32, i32) {
    %c0_i32 = arith.constant 0 : i32
    %c0_i32_0 = arith.constant 0 : i32
    %c0_i32_1 = arith.constant 0 : i32
    return %c0_i32, %c0_i32_0 : i32, i32
  }
  func.func @transform_11(%arg0: i32) -> (i32, i32) {
    %c0_i32 = arith.constant 0 : i32
    %c0_i32_0 = arith.constant 0 : i32
    %c0_i32_1 = arith.constant 0 : i32
    return %c0_i32, %c0_i32_0 : i32, i32
  }
  func.func @transform_12(%arg0: i32) -> (i32, i32) {
    %c0_i32 = arith.constant 0 : i32
    %c0_i32_0 = arith.constant 0 : i32
    %c0_i32_1 = arith.constant 0 : i32
    return %c0_i32, %c0_i32_0 : i32, i32
  }
  func.func @transform_13(%arg0: i32) -> (i32, i32) {
    %c0_i32 = arith.constant 0 : i32
    %c0_i32_0 = arith.constant 0 : i32
    %c0_i32_1 = arith.constant 0 : i32
    return %c0_i32, %c0_i32_0 : i32, i32
  }
  func.func @transform_14(%arg0: i32) -> (i32, i32) {
    %c0_i32 = arith.constant 0 : i32
    %c0_i32_0 = arith.constant 0 : i32
    %c0_i32_1 = arith.constant 0 : i32
    return %c0_i32, %c0_i32_0 : i32, i32
  }
  func.func @transform_15(%arg0: i32) -> (i32, i32, i32) {
    %c0_i32 = arith.constant 0 : i32
    %c0_i32_0 = arith.constant 0 : i32
    %c0_i32_1 = arith.constant 0 : i32
    return %arg0, %c0_i32, %c0_i32_0 : i32, i32, i32
  }
}

</mosaic_0001>

<bundles_post_ra>
// kernel: tpu_custom_call.1
= control target key start
LH: loop header
LB: loop body
LE: loop exit
PB: predicated region body
PF: predicated region fallthrough
CT: control target
= control target key end

     0   :  { %s2186_s0 = inlined_call_operand.vmem [shape: f32[2,3], index: 0, kind: input, shape index: {}]   ;;  %s2187_s1 = inlined_call_operand.vmem [shape: f32[2,18,72], index: 1, kind: input, shape index: {}]   ;;  %s2188_s2 = inlined_call_operand.vmem [shape: f32[2,16,64], index: 2, kind: input, shape index: {}]   ;;  %s2189_s3 = inlined_call_operand.vmem [shape: bf16[72,72], index: 3, kind: input, shape index: {}]   ;;  %s2190_s4 = inlined_call_operand.vmem [shape: f32[1,72], index: 4, kind: input, shape index: {}]   ;;  %s2191_s5 = inlined_call_operand.vmem [shape: f32[1,72], index: 5, kind: input, shape index: {}]   ;;  %s2192_s6 = inlined_call_operand.vmem [shape: bf16[3,72,64], index: 6, kind: input, shape index: {}]   ;;  %s2193_s7 = inlined_call_operand.vmem [shape: f32[1,64], index: 7, kind: input, shape index: {}]   ;;  %s2194_s8 = inlined_call_operand.vmem [shape: f32[1,64], index: 8, kind: input, shape index: {}]   ;;  %s2195_s9 = inlined_call_operand.vmem [shape: bf16[64,256], index: 9, kind: input, shape index: {}]   ;;  %s2196_s10 = inlined_call_operand.vmem [shape: f32[1,256], index: 10, kind: input, shape index: {}]   ;;  %s2197_s11 = inlined_call_operand.vmem [shape: f32[1,256], index: 11, kind: input, shape index: {}]   ;;  %s2198_s12 = inlined_call_operand.vmem [shape: bf16[64,256], index: 12, kind: input, shape index: {}]   ;;  %s2199_s13 = inlined_call_operand.vmem [shape: f32[1,256], index: 13, kind: input, shape index: {}]   ;;  %s2200_s14 = inlined_call_operand.vmem [shape: f32[1,256], index: 14, kind: input, shape index: {}]   ;;  %s2201_s15 = inlined_call_operand.hbm [shape: f32[2,16,256], index: 15, kind: output, shape index: {}]  }
   0x1   :  { %2206 = sst [smem:[#allocation13_spill]] %s2186_s0 }
   0x2   :  { %2207 = sst [smem:[#allocation14_spill]] %s2187_s1 }
   0x3   :  { %20 = vsyncpa [#allocation5], 0 }
   0x4   :  { %21 = vsyncpa [#allocation4], 0 }
   0x5   :  { %23 = vsyncpa [#allocation4 + $0x1], 0  ;;  %s1807_s18 = smov 0   ;;  %s1809_s19 = smov 0  }
   0x6   :  { %s1811_s20 = smov 0   ;;  %s1813_s21 = smov 0  }
   0x7 LB: > { %2208 = sst [smem:[#allocation9_spill]] %s1718_s20  ;;  %s1828_s22 = sadd.s32 4294967295, %s1722_s21   ;;  %s1722_s21 = sphi %s1813_s21, %s2217_s21   ;;  %s1718_s20 = sphi %s1811_s20, %s2219_s20   ;;  %s1714_s19 = sphi %s1809_s19, %s2221_s19   ;;  %s1710_s18 = sphi %s1807_s18, %s2220_s18  }
   0x8   : > { %s1299_s23 = sadd.s32 4294967294, %s1722_s21   ;;  %s1832_s24 = sadd.s32 1, %s1722_s21  }
   0x9   : > { %2209 = sst [smem:[#allocation10_spill]] %s1832_s24  ;;  %s361_s25 = sadd.s32 1, %s1718_s20 }
   0xa   : > { %s358_s26 = ssub.s32 %s1722_s21, %s1832_s24  ;;  %p371_p0 = scmp.ne.s32.totalorder %s1718_s20, %s1714_s19 }
   0xb   : > { %p359_p1 = scmp.eq.s32.totalorder %s358_s26, 0  ;;  %p372_p2 = scmp.eq.s32.totalorder %s1828_s22, 1 }
   0xc   : > { %p377_p3 = scmp.ne.s32.totalorder %s1714_s19, %s1710_s18  ;;  %p378_p4 = scmp.eq.s32.totalorder %s1299_s23, 1 }
   0xd   : > { %s1843_s27 = scalar_select %p359_p1, %s1718_s20, %s361_s25  }
   0xe   : > { %p1845_p5 = por %p372_p2, %p371_p0  ;;  %p1849_p6 = por %p378_p4, %p377_p3 }
   0xf   : > { %2210 = sst [smem:[#allocation11_spill]] %s1843_s27  ;;  %p1300_p7 = scmp.ge.s32.totalorder %s1722_s21, 1 }
  0x10   : > { %s2212_s29 = scalar_select %p1849_p6, 1, 0 }
  0x11   : > { %p385_p8 = scmp.lt.s32.totalorder %s1722_s21, 3  ;;  %p1579_p9 = scmp.eq.s32.totalorder %s1828_s22, 0 }
  0x12   : > { %2213 = sst [smem:[#allocation12_spill]] %s2212_s29  ;;  %s1724_s23 = smov [#allocation3]  }
  0x13   : > { %p386_p10 = pnand %p1300_p7, %p385_p8  ;;  %s2214_s0 = sld [smem:[#allocation13_spill]] }
  0x15   : > { %p1571_p11 = pneg %p386_p10 }
  0x16   : > { %462 = sbr.rel (%p386_p10) target bundleno = 611 (0x263), region = 80 }
  0x17   : > { %p1572_p12 = pnand %p1579_p9, %p1571_p11 }
  0x19   : > { %s397_s17 = sshll.u32 %s2214_s0, 4  ;;  %s398_s17 = int_to_ptr.vmem [resolvable:$true] %s397_s17 }
  0x1a   : > { %1574 = dma.vmem_to_smem (!%p1572_p12), %s398_s17, 32, %s1724_s23, [#allocation5]  }
  0x1b   : > { %1701 = dma.done.wait (%p1579_p9), [#allocation5], 32  }
  0x1c   : > { %1703 = vsyncadd (%p1579_p9), [#allocation5], 4294967264 }
  0x1d   : > { %469 = sfence }
  0x1e   : > { %v541_v0 = vld [vmem:[%s2189_s3 + $0x20] sm:$0xf]  ;;  %vm576_vm0 = vcmask 1043456   ;;  %p517_p13 = scmp.lt.s32.totalorder %s1828_s22, 1  ;;  %v1478_v4 = vld [vmem:[%s2189_s3 + $0x18] sm:$0xff]  ;;  %v1477_v5 = vld [vmem:[%s2189_s3 + $0x10] sm:$0xff] }
  0x1f   : > { %v559_v1 = vunpack.c.l.b16 %v541_v0  ;;  %v1476_v6 = vld [vmem:[%s2189_s3 + $0x8] sm:$0xff]  ;;  %s2215_s1 = sld [smem:[#allocation14_spill]]  ;;  %v1475_v7 = vld [vmem:[%s2189_s3] sm:$0xff]  ;;  %vm569_vm1 = vcmask 588800   ;;  %v1482_v41 = vld [vmem:[%s2192_s6 + $0x18] sm:$0xff]  ;;  %s1676_s27 = scalar_lea.hbm %s2201_s15, 64 }
  0x20   : > { %s1868_s17 = scalar_select %p517_p13, %s1828_s22, 1  ;;  %v1617_v13 = vld [vmem:[%s2190_s4] ss:$0 sm:$0xff]  ;;  %v1337_v42 = vld [vmem:[%s2192_s6 + $0x44] sm:$0xf]  ;;  %v1481_v51 = vld [vmem:[%s2192_s6 + $0x10] sm:$0xff] }
  0x21   : > { %v564_v2 = vpack.c.b16 %v559_v1, %v559_v1  ;;  %v1618_v14 = vld [vmem:[%s2191_s5] ss:$0 sm:$0xff]  ;;  %v765_v44 = vunpack.c.l.b16 %v1337_v42  ;;  %v1380_v45 = vld [vmem:[%s2192_s6 + $0x68] sm:$0xf]  ;;  %s1916_s20 = sld [smem:[#allocation3]] }
  0x22   : > { %s1508_s26 = smul.u32 24, %s1868_s17  ;;  %v734_v29 = vld [vmem:[%s2192_s6 + $0x20] sm:$0xf]  ;;  %v872_v47 = vunpack.c.l.b16 %v1380_v45  ;;  %s1918_s24 = sld [smem:[#allocation3 + $0x1]]  ;;  %v1480_v0 = vld [vmem:[%s2192_s6 + $0x8] sm:$0xff] }
  0x23   : > { %v578_v3 = vsel %vm576_vm0, %v564_v2, 0  ;;  %v812_v31 = vunpack.c.l.b16 %v734_v29  ;;  %v770_v50 = vpack.c.b16 %v765_v44, %v765_v44  ;;  %v1486_v63 = vld [vmem:[%s2192_s6 + $0x3c] sm:$0xff]  ;;  %s1466_s25 = sld [smem:[#allocation3 + $0x80]] }
  0x24   : > { %583 = vmatpush.bf16.msra.mxu0 %v578_v3  ;;  %v877_v52 = vpack.c.b16 %v872_v47, %v872_v47  ;;  %v1490_v3 = vld [vmem:[%s2192_s6 + $0x60] sm:$0xff]  ;;  %s1468_s30 = sld [smem:[#allocation3 + $0x82]] }
  0x25   : > { %s521_s29 = scalar_lea.vmem %s2215_s1, %s1508_s26  ;;  %v817_v33 = vpack.c.b16 %v812_v31, %v812_v31  ;;  %v779_v55 = vsel %vm576_vm0, %v770_v50, 0  ;;  %v1483_v31 = vld [vmem:[%s2192_s6 + $0x24] sm:$0xff]  ;;  %s1467_s26 = sld [smem:[#allocation3 + $0x81]] }
  0x26   : > { %v528_v8 = vld [vmem:[%s521_s29] sm:$0xff]  ;;  %v529_v9 = vld [vmem:[%s521_s29 + $0x8] sm:$0xff]  ;;  %v530_v11 = vld [vmem:[%s521_s29 + $0x10] sm:$0x3]  ;;  %784 = vmatpush.bf16.msra.mxu1 %v779_v55  ;;  %v886_v59 = vsel %vm576_vm0, %v877_v52, 0 }
  0x27   : > { %v531_v10 = vpack.c.bf16 %v529_v9, %v528_v8  ;;  %v532_v12 = vpack.c.bf16 %v530_v11, %v530_v11  ;;  %v826_v39 = vsel %vm576_vm0, %v817_v33, 0  ;;  %891 = vmatpush.bf16.msra.mxu3 %v886_v59  ;;  %v1485_v11 = vld [vmem:[%s2192_s6 + $0x34] sm:$0xff] }
  0x28   : > { %584 = vmatpush.bf16.msra.mxu0 %v1478_v4  ;;  %831 = vmatpush.bf16.msra.mxu2 %v826_v39  ;;  %v1940_v4 = vstv %s1916_s20  ;;  %s1474_s20 = sshll.u32 %s1868_s17, 4 }
  0x29   : > { %s526_s23 = scalar_lea.vmem %s2188_s2, %s1474_s20  ;;  %s1507_s20 = sshll.u32 %s1828_s22, 5 }
  0x2a   : > { %785 = vmatpush.bf16.msra.mxu1 %v1486_v63  ;;  %s1209_s17 = scalar_lea.hbm %s2201_s15, %s1507_s20 }
  0x2b   : > { %892 = vmatpush.bf16.msra.mxu3 %v1490_v3 }
  0x2c   : > { %585 = vmatpush.bf16.msra.mxu0 %v1477_v5  ;;  %832 = vmatpush.bf16.msra.mxu2 %v1482_v41  ;;  %v693_v5 = vlaneseq }
  0x2e   : > { %786 = vmatpush.bf16.msra.mxu1 %v1485_v11 }
  0x30   : > { %586 = vmatpush.bf16.msra.mxu0 %v1476_v6  ;;  %833 = vmatpush.bf16.msra.mxu2 %v1481_v51 }
  0x34   : > { %587 = vmatpush.bf16.msra.mxu0 %v1475_v7  ;;  %834 = vmatpush.bf16.msra.mxu2 %v1480_v0 }
  0x37   : > { %1325 = vmatmul.msk.bf16.vlgmr.msra.gmra.mxu0 %vm569_vm1, %v531_v10  ;;  %v1945_v10 = vstv %s1918_s24  ;;  %s1962_s24 = sld [smem:[#allocation3 + $0x2]] }
  0x47   : > { %1326 = vmatmul.msk.bf16.gmra.mxu0 %vm569_vm1, %v532_v12  ;;  %v1479_v12 = vld [vmem:[%s2192_s6] sm:$0xff] }
  0x48   : > { %835 = vmatpush.bf16.msra.mxu2 %v1479_v12 }
  0xb4   : > { %v589_v15 = vpop.f32.mrf.mxu0 }
  0xb5   : > { %v602_v16 = vmul.f32 %v1617_v13, %v589_v15  ;;  %v1489_v15 = vld [vmem:[%s2192_s6 + $0x58] sm:$0xff] }
  0xb6   : > { %893 = vmatpush.bf16.msra.mxu3 %v1489_v15 }
  0xb7   : > { %v1891_v17 = vadd.f32 %v1618_v14, %v602_v16 }
  0xb9   : > { %v612_v18 = vsub.f32 0.0, %v1891_v17 }
  0xbb   : > { %v615_v19 = vmul.f32 1.442695, %v612_v18  ;;  %v1960_v18 = vand.u32 127, %v693_v5 }
  0xbc   : > { %v591_v20 = vpop.f32.mrf.mxu0 }
  0xbd   : > { %1621 = vpow2.f32 %v615_v19  ;;  %v603_v21 = vmul.f32 %v1617_v13, %v591_v20  ;;  %vm708_vm11 = vcmp.ge.s32.totalorder %v1960_v18, 4  ;;  %vm712_vm14 = vcmp.lt.s32.totalorder %v1960_v18, 68  ;;  %v1458_v18 = vld [vmem:[%s2198_s12 + $0x30] sm:$0xf] }
  0xbf   : > { %v1894_v22 = vadd.f32 %v1618_v14, %v603_v21 }
  0xc1   : > { %v613_v23 = vsub.f32 0.0, %v1894_v22 }
  0xc3   : > { %v1622_v24 = vpop.eup %1621  ;;  %v617_v25 = vmul.f32 1.442695, %v613_v23 }
  0xc4   : > { %v621_v26 = vadd.f32 1.0, %v1622_v24  ;;  %v594_v27 = vpop.f32.mrf.mxu0  ;;  %v1484_v24 = vld [vmem:[%s2192_s6 + $0x2c] sm:$0xff] }
  0xc5   : > { %1623 = vpow2.f32 %v617_v25  ;;  %v604_v28 = vmul.f32 %v1617_v13, %v594_v27  ;;  %v1488_v25 = vld [vmem:[%s2192_s6 + $0x50] sm:$0xff]  ;;  %787 = vmatpush.bf16.msra.mxu1 %v1484_v24  ;;  %v1450_v24 = vld [vmem:[%s2198_s12 + $0x20] sm:$0xf] }
  0xc6   : > { %1625 = vrcp.f32 %v621_v26  ;;  %v635_v46 = vand.u32 2147483648, %v621_v26  ;;  %v633_v49 = vand.u32 2147483647, %v621_v26  ;;  %vm629_vm3 = vweird.f32 %v621_v26  ;;  %894 = vmatpush.bf16.msra.mxu3 %v1488_v25  ;;  %v1504_v25 = vld [vmem:[%s2198_s12 + $0x24] sm:$0xf0] }
  0xc7   : > { %v1900_v30 = vadd.f32 %v1618_v14, %v604_v28 }
  0xc8   : > { %v636_v57 = vor.u32 1.1754944e-38, %v635_v46  ;;  %vm634_vm5 = vcmp.eq.f32.partialorder %v633_v49, 8.507059e+37 }
  0xc9   : > { %v614_v32 = vsub.f32 0.0, %v1900_v30  ;;  %788 = vmatpush.bf16.msra.mxu1 %v1483_v31  ;;  %v1460_v31 = vld [vmem:[%s2198_s12 + $0x38] sm:$0xf0] }
  0xcb   : > { %v1624_v34 = vpop.eup %1623  ;;  %v619_v35 = vmul.f32 1.442695, %v614_v32 }
  0xcc   : > { %v1626_v36 = vpop.eup %1625  ;;  %v1903_v37 = vadd.f32 1.0, %v1624_v34  ;;  %v596_v38 = vpop.f32.mrf.mxu0  ;;  %v1487_v34 = vld [vmem:[%s2192_s6 + $0x48] sm:$0xff] }
  0xcd   : > { %v625_v40 = vmul.f32 %v1626_v36, %v621_v26  ;;  %1627 = vpow2.f32 %v619_v35  ;;  %vm630_vm2 = vweird.f32 %v1626_v36  ;;  %895 = vmatpush.bf16.msra.mxu3 %v1487_v34 }
  0xce   : > { %1629 = vrcp.f32 %v1903_v37  ;;  %vm631_vm4 = vmor %vm629_vm3, %vm630_vm2  ;;  %v650_v6 = vand.u32 2147483648, %v1903_v37  ;;  %v648_v9 = vand.u32 2147483647, %v1903_v37  ;;  %vm644_vm7 = vweird.f32 %v1903_v37 }
  0xcf   : > { %v626_v43 = vsub.f32 1.0, %v625_v40 }
  0xd0   : > { %v651_v19 = vor.u32 1.1754944e-38, %v650_v6  ;;  %vm649_vm9 = vcmp.eq.f32.partialorder %v648_v9, 8.507059e+37 }
  0xd1   : > { %v627_v48 = vmul.f32 %v1626_v36, %v626_v43  ;;  %v689_v43 = vstv %s1962_s24  ;;  %s514_s24 = sand.u32 1, %s1714_s19  }
  0xd2   : > { %s1305_s16 = sshll.u32 %s514_s24, 5  ;;  %s1198_s22 = scalar_lea.sflag [#allocation4], %s514_s24 }
  0xd3   : > { %v1628_v53 = vpop.eup %1627  ;;  %v628_v54 = vadd.f32 %v1626_v36, %v627_v48  ;;  %s2146_s0 = scalar_lea.vmem [#allocation6], %s1305_s16 }
  0xd4   : > { %v1630_v56 = vpop.eup %1629  ;;  %v1924_v58 = vadd.f32 1.0, %v1628_v53  ;;  %s1210_s29 = sshll.u32 %s2146_s0, 4  ;;  %s1211_s29 = int_to_ptr.vmem [resolvable:$true] %s1210_s29 }
  0xd5   : > { %v632_v60 = vsel %vm631_vm4, %v1626_v36, %v628_v54  ;;  %v640_v61 = vmul.f32 %v1630_v56, %v1903_v37  ;;  %vm645_vm6 = vweird.f32 %v1630_v56 }
  0xd6   : > { %v637_v62 = vsel %vm634_vm5, %v636_v57, %v632_v60  ;;  %1631 = vrcp.f32 %v1924_v58  ;;  %vm646_vm8 = vmor %vm644_vm7, %vm645_vm6  ;;  %v665_v36 = vand.u32 2147483648, %v1924_v58  ;;  %v663_v40 = vand.u32 2147483647, %v1924_v58 }
  0xd7   : > { %v669_v1 = vmul.f32 %v637_v62, %v1891_v17  ;;  %v641_v2 = vsub.f32 1.0, %v640_v61  ;;  %v1958_v17 = vshrl.u32 %v693_v5, 7  ;;  %vm659_vm15 = vweird.f32 %v1924_v58  ;;  %vm714_vm6 = vmand %vm708_vm11, %vm712_vm14 }
  0xd8   : > { %v666_v46 = vor.u32 1.1754944e-38, %v665_v36  ;;  %vm664_vm4 = vcmp.eq.f32.partialorder %v663_v40, 8.507059e+37  ;;  %v1498_v36 = vld [vmem:[%s2195_s9 + $0x34] sm:$0xf0] }
  0xd9   : > { %v675_v7 = vmax.f32 %v669_v1, 0.0  ;;  %v642_v8 = vmul.f32 %v1630_v56, %v641_v2  ;;  %vm699_vm10 = vcmp.ge.s32.totalorder %v1958_v17, 1 }
  0xda   : > { %vm709_vm13 = vmand %vm699_vm10, %vm708_vm11 }
  0xdb   : > { %v679_v13 = vmin.f32 %v1940_v4, %v675_v7  ;;  %v643_v14 = vadd.f32 %v1630_v56, %v642_v8  ;;  %vm713_vm3 = vmand %vm709_vm13, %vm712_vm14 }
  0xdc   : > { %v1632_v16 = vpop.eup %1631 }
  0xdd   : > { %v683_v20 = vmul.f32 %v1945_v10, %v679_v13  ;;  %v647_v21 = vsel %vm646_vm8, %v1630_v56, %v643_v14  ;;  %v655_v23 = vmul.f32 %v1632_v16, %v1924_v58  ;;  %vm660_vm12 = vweird.f32 %v1632_v16 }
  0xde   : > { %v652_v26 = vsel %vm649_vm9, %v651_v19, %v647_v21  ;;  %vm661_vm0 = vmor %vm659_vm15, %vm660_vm12  ;;  %vm721_vm12 = vcmask 582656   ;;  %v1506_v19 = vld [vmem:[%s2198_s12 + $0x34] sm:$0xf0] }
  0xdf   : > { %v1511_v27 = vcvt.f32.s32 %v683_v20  ;;  %v670_v28 = vmul.f32 %v652_v26, %v1894_v22  ;;  %v656_v29 = vsub.f32 1.0, %v655_v23  ;;  %v1509_v35 = vand.u32 2147483647, %v683_v20  ;;  %v2024_v26 = vld [vmem:[%s2193_s7] ss:$0 sm:$0xff] }
  0xe0   : > { %v1514_v38 = vand.u32 2147483648, %v683_v20  ;;  %v1459_v21 = vor.u32 %v1506_v19, %v1458_v18  ;;  %v1499_v18 = vld [vmem:[%s2198_s12 + $0x4] sm:$0xf]  ;;  %v1436_v19 = vld [vmem:[%s2198_s12 + $0x8] sm:$0xf0] }
  0xe1   : > { %v1512_v32 = vcvt.s32.f32 %v1511_v27  ;;  %v676_v33 = vmax.f32 %v670_v28, 0.0  ;;  %v657_v22 = vmul.f32 %v1632_v16, %v656_v29  ;;  %vm1510_vm2 = vcmp.lt.f32.partialorder %v1509_v35, 8388608.0  ;;  %v1505_v29 = vld [vmem:[%s2198_s12 + $0x34] sm:$0xf]  ;;  %v1426_v35 = vld [vmem:[%s2195_s9 + $0x38] sm:$0xf0] }
  0xe2   : > { %1119 = vmatpush.bf16.msrb.mxu3 %v1459_v21  ;;  %v1451_v27 = vor.u32 %v1504_v25, %v1450_v24  ;;  %v1463_v34 = vor.u32 %v1505_v29, %v1460_v31 }
  0xe3   : > { %v1513_v37 = vand.u32 2147483647, %v1512_v32  ;;  %v680_v39 = vmin.f32 %v1940_v4, %v676_v33  ;;  %v658_v41 = vadd.f32 %v1632_v16, %v657_v22  ;;  %v1497_v32 = vld [vmem:[%s2195_s9 + $0x34] sm:$0xf]  ;;  %v1424_v22 = vld [vmem:[%s2195_s9 + $0x30] sm:$0xf] }
  0xe4   : > { %v1425_v40 = vor.u32 %v1498_v36, %v1424_v22  ;;  %1133 = vmatpush.bf16.msrb.mxu0 %v1463_v34 }
  0xe5   : > { %v1515_v42 = vor.u32 %v1514_v38, %v1513_v37  ;;  %v684_v44 = vmul.f32 %v1945_v10, %v680_v39  ;;  %v662_v45 = vsel %vm661_vm0, %v1632_v16, %v658_v41  ;;  %v2047_v38 = vld [vmem:[%s2194_s8] ss:$0 sm:$0xff]  ;;  %v1429_v39 = vor.u32 %v1497_v32, %v1426_v35  ;;  %v1442_v41 = vld [vmem:[%s2198_s12 + $0x10] sm:$0xf] }
  0xe6   : > { %v667_v50 = vsel %vm664_vm4, %v666_v46, %v662_v45  ;;  %1120 = vmatpush.bf16.msrb.mxu3 %v1451_v27  ;;  %v1503_v45 = vld [vmem:[%s2198_s12 + $0x24] sm:$0xf]  ;;  %v1452_v46 = vld [vmem:[%s2198_s12 + $0x28] sm:$0xf0]  ;;  %1013 = vmatpush.bf16.msrb.mxu1 %v1425_v40 }
  0xe7   : > { %v1516_v47 = vsel %vm1510_vm2, %v1515_v42, %v683_v20  ;;  %v1519_v48 = vcvt.f32.s32 %v684_v44  ;;  %v671_v52 = vmul.f32 %v667_v50, %v1900_v30  ;;  %v1517_v54 = vand.u32 2147483647, %v684_v44  ;;  %v1502_v42 = vld [vmem:[%s2198_s12 + $0x14] sm:$0xf0]  ;;  %1027 = vmatpush.bf16.msrb.mxu2 %v1429_v39  ;;  %v1418_v50 = vld [vmem:[%s2195_s9 + $0x28] sm:$0xf0] }
  0xe8   : > { %v690_v49 = vmul.f32 %v1516_v47, %v689_v43  ;;  %v1522_v56 = vand.u32 2147483648, %v684_v44  ;;  %v696_v30 = vadd.s32 16, %v1958_v17  ;;  %v1495_v47 = vld [vmem:[%s2195_s9 + $0x24] sm:$0xf] }
  0xe9   : > { %v1520_v51 = vcvt.s32.f32 %v1519_v48  ;;  %v677_v57 = vmax.f32 %v671_v52, 0.0  ;;  %vm1518_vm5 = vcmp.lt.f32.partialorder %v1517_v54, 8388608.0  ;;  %v1496_v52 = vld [vmem:[%s2195_s9 + $0x24] sm:$0xf0]  ;;  %v1421_v54 = vor.u32 %v1495_v47, %v1418_v50 }
  0xea   : > { %v716_v53 = vsel %vm713_vm3, %v690_v49, 0.0  ;;  %vm704_vm7 = vcmp.le.s32.totalorder %v696_v30, 16  ;;  %v1455_v49 = vor.u32 %v1503_v45, %v1452_v46  ;;  %v1493_v30 = vld [vmem:[%s2195_s9 + $0x14] sm:$0xf] }
  0xeb   : > { %719 = vst.msk [vmem:[#allocation2] sm:$0xff] %vm569_vm1, %v716_v53  ;;  %v1521_v55 = vand.u32 2147483647, %v1520_v51  ;;  %v681_v59 = vmin.f32 %v1940_v4, %v677_v57  ;;  %vm711_vm8 = vmand %vm704_vm7, %vm708_vm11  ;;  %v1416_v51 = vld [vmem:[%s2195_s9 + $0x20] sm:$0xf]  ;;  %1028 = vmatpush.bf16.msrb.mxu2 %v1421_v54 }
  0xec   : > { %vm715_vm10 = vmand %vm711_vm8, %vm712_vm14  ;;  %v1500_v57 = vld [vmem:[%s2198_s12 + $0x4] sm:$0xf0]  ;;  %1134 = vmatpush.bf16.msrb.mxu0 %v1455_v49  ;;  %v1143_v54 = vld [vmem:[%s2199_s13] sm:$0x3] }
  0xed   : > { %v1523_v58 = vor.u32 %v1522_v56, %v1521_v55  ;;  %v685_v61 = vmul.f32 %v1945_v10, %v681_v59  ;;  %v1417_v55 = vor.u32 %v1496_v52, %v1416_v51  ;;  %v1434_v56 = vld [vmem:[%s2198_s12] sm:$0xf] }
  0xee   : > { %v1435_v59 = vor.u32 %v1500_v57, %v1434_v56  ;;  %v1145_v56 = vperm.slane %v1143_v54, 0  ;;  %v1047_v57 = vld [vmem:[%s2197_s11] sm:$0x3] }
  0xef   : > { %v1524_v60 = vsel %vm1518_vm5, %v1523_v58, %v684_v44  ;;  %v1527_v63 = vcvt.f32.s32 %v685_v61  ;;  %v1525_v2 = vand.u32 2147483647, %v685_v61  ;;  %v1530_v4 = vand.u32 2147483648, %v685_v61  ;;  %1014 = vmatpush.bf16.msrb.mxu1 %v1417_v55  ;;  %v1037_v55 = vld [vmem:[%s2196_s10] sm:$0x3] }
  0xf0   : > { %v691_v62 = vmul.f32 %v1524_v60, %v689_v43 }
  0xf1   : > { %v1528_v1 = vcvt.s32.f32 %v1527_v63  ;;  %vm1526_vm9 = vcmp.lt.f32.partialorder %v1525_v2, 8388608.0  ;;  %v1444_v2 = vld [vmem:[%s2198_s12 + $0x18] sm:$0xf0] }
  0xf2   : > { %v717_v0 = vsel %vm714_vm6, %v691_v62, 0.0  ;;  %v723_v8 = vld [vmem:[#allocation2] sm:$0xff]  ;;  %v1410_v62 = vld [vmem:[%s2195_s9 + $0x18] sm:$0xf0] }
  0xf3   : > { %720 = vst.msk [vmem:[#allocation2 + $0x8] sm:$0xff] %vm569_vm1, %v717_v0  ;;  %v1529_v3 = vand.u32 2147483647, %v1528_v1  ;;  %v1413_v0 = vor.u32 %v1493_v30, %v1410_v62  ;;  %v1501_v1 = vld [vmem:[%s2198_s12 + $0x14] sm:$0xf] }
  0xf5   : > { %v1531_v5 = vor.u32 %v1530_v4, %v1529_v3  ;;  %v1408_v3 = vld [vmem:[%s2195_s9 + $0x10] sm:$0xf]  ;;  %1029 = vmatpush.bf16.msrb.mxu2 %v1413_v0  ;;  %v1146_v0 = vperm.slane %v1143_v54, 1 }
  0xf7   : > { %v1532_v6 = vsel %vm1526_vm9, %v1531_v5, %v685_v61 }
  0xf8   : > { %v692_v7 = vmul.f32 %v1532_v6, %v689_v43  ;;  %v1443_v43 = vor.u32 %v1502_v42, %v1442_v41  ;;  %v1447_v6 = vor.u32 %v1501_v1, %v1444_v2 }
  0xfa   : > { %v724_v9 = vld [vmem:[#allocation2 + $0x8] sm:$0xff]  ;;  %v718_v11 = vsel %vm715_vm10, %v692_v7, 0.0  ;;  %1121 = vmatpush.bf16.msrb.mxu3 %v1443_v43  ;;  %v1494_v7 = vld [vmem:[%s2195_s9 + $0x14] sm:$0xf0]  ;;  %1135 = vmatpush.bf16.msrb.mxu0 %v1447_v6 }
  0xfb   : > { %v725_v10 = vpack.c.bf16 %v724_v9, %v723_v8  ;;  %722 = vst.msk [vmem:[#allocation2 + $0x10] sm:$0x3] %vm721_vm12, %v718_v11  ;;  %v735_v12 = vld [vmem:[#allocation2 + $0x1] sm:$0xff] }
  0xfc   : > { %v842_v14 = vld [vmem:[#allocation2 + $0x2] sm:$0xff] }
  0xfd   : > { %1371 = vmatmul.msk.bf16.vlgmr.msra.gmra.mxu2 %vm569_vm1, %v725_v10  ;;  %v1061_v8 = vld [vmem:[%s526_s23] sm:$0xff]  ;;  %v1062_v9 = vld [vmem:[%s526_s23 + $0x8] sm:$0xff]  ;;  %v1409_v10 = vor.u32 %v1494_v7, %v1408_v3 }
  0xfe   : > { %1122 = vmatpush.bf16.msrb.mxu3 %v1435_v59  ;;  %v1063_v11 = vpack.c.bf16 %v1062_v9, %v1061_v8  ;;  %v1050_v8 = vperm.slane %v1047_v57, 1 }
  0xff   : > { %1015 = vmatpush.bf16.msrb.mxu1 %v1409_v10 }
 0x102   : > { %v736_v13 = vld [vmem:[#allocation2 + $0x9] sm:$0xff] }
 0x103   : > { %v843_v15 = vld [vmem:[#allocation2 + $0xa] sm:$0xff]  ;;  %v737_v16 = vpack.c.bf16 %v736_v13, %v735_v12  ;;  %v1491_v13 = vld [vmem:[%s2195_s9 + $0x4] sm:$0xf] }
 0x104   : > { %v844_v17 = vpack.c.bf16 %v843_v15, %v842_v14  ;;  %v1402_v14 = vld [vmem:[%s2195_s9 + $0x8] sm:$0xf0]  ;;  %v1400_v15 = vld [vmem:[%s2195_s9] sm:$0xf] }
 0x105   : > { %1354 = vmatmul.msk.bf16.vlgmr.msra.gmra.mxu1 %vm569_vm1, %v737_v16  ;;  %v1405_v16 = vor.u32 %v1491_v13, %v1402_v14  ;;  %v1174_v13 = vstv %s1466_s25  ;;  %s1212_s25 = sshll.u32 %s1209_s17, 4  ;;  %s1213_s25 = int_to_ptr.hbm [resolvable:$true] %s1212_s25 }
 0x106   : > { %1397 = vmatmul.msk.bf16.vlgmr.msra.gmra.mxu3 %vm569_vm1, %v844_v17  ;;  %vm1005_vm1 = vcmask 523264   ;;  %v1492_v17 = vld [vmem:[%s2195_s9 + $0x4] sm:$0xf0] }
 0x107   : > { %v1401_v21 = vor.u32 %v1492_v17, %v1400_v15  ;;  %1030 = vmatpush.bf16.msrb.mxu2 %v1405_v16 }
 0x109   : > { %1016 = vmatpush.bf16.msrb.mxu1 %v1401_v21 }
 0x116   : > { %1464 = vmatmul.msk.bf16.vlgmr.msrb.gmra.mxu3 %vm1005_vm1, %v1063_v11 }
 0x180   : > { %v837_v23 = vpop.f32.mrf.mxu2 }
 0x182   : > { %v790_v20 = vpop.f32.mrf.mxu1 }
 0x183   : > { %v838_v28 = vadd.f32 %v837_v23, %v790_v20  ;;  %v1439_v23 = vor.u32 %v1499_v18, %v1436_v19  ;;  %v1179_v19 = vstv %s1467_s26  ;;  %s1670_s26 = sshra.s32 %s1213_s25, 4  ;;  %s1671_s26 = int_to_ptr.hbm [resolvable:$true] %s1670_s26 }
 0x184   : > { %p1677_p3 = scmp.lt.s32.totalorder %s1671_s26, %s2201_s15 }
 0x185   : > { %1136 = vmatpush.bf16.msrb.mxu0 %v1439_v23 }
 0x188   : > { %v839_v58 = vpop.f32.mrf.mxu2  ;;  %1465 = vmatmul.msk.bf16.vlgmr.msrb.gmra.mxu0 %vm1005_vm1, %v1063_v11 }
 0x189   : > { %v897_v33 = vpop.f32.mrf.mxu3 }
 0x18a   : > { %v902_v37 = vadd.f32 %v897_v33, %v838_v28  ;;  %v792_v48 = vpop.f32.mrf.mxu1 }
 0x18b   : > { %v840_v61 = vadd.f32 %v839_v58, %v792_v48  ;;  %v1039_v58 = vperm.slane %v1037_v55, 0 }
 0x18c   : > { %v908_v44 = vmul.f32 %v2024_v26, %v902_v37 }
 0x18e   : > { %v2076_v53 = vadd.f32 %v2047_v38, %v908_v44 }
 0x190   : > { %v916_v60 = vsub.f32 0.0, %v2076_v53 }
 0x191   : > { %v899_v63 = vpop.f32.mrf.mxu3 }
 0x192   : > { %v918_v4 = vmul.f32 1.442695, %v916_v60  ;;  %v903_v5 = vadd.f32 %v899_v63, %v840_v61  ;;  %v1049_v60 = vperm.slane %v1047_v57, 0 }
 0x194   : > { %1633 = vpow2.f32 %v918_v4  ;;  %v909_v12 = vmul.f32 %v2024_v26, %v903_v5  ;;  %v1040_v4 = vperm.slane %v1037_v55, 1 }
 0x196   : > { %v915_v20 = vadd.f32 %v2047_v38, %v909_v12 }
 0x198   : > { %v917_v24 = vsub.f32 0.0, %v915_v20 }
 0x199   : > { %v1124_v59 = vpop.f32.mrf.mxu3 }
 0x19a   : > { %v1634_v25 = vpop.eup %1633  ;;  %v920_v26 = vmul.f32 1.442695, %v917_v24  ;;  %v1149_v61 = vmul.f32 %v1145_v56, %v1124_v59 }
 0x19b   : > { %v922_v27 = vadd.f32 1.0, %v1634_v25 }
 0x19c   : > { %1635 = vpow2.f32 %v920_v26 }
 0x19d   : > { %1637 = vrcp.f32 %v922_v27  ;;  %v935_v37 = vand.u32 2147483648, %v922_v27  ;;  %vm929_vm13 = vweird.f32 %v922_v27  ;;  %v933_v38 = vand.u32 2147483647, %v922_v27 }
 0x19f   : > { %v936_v44 = vor.u32 1.1754944e-38, %v935_v37  ;;  %vm934_vm0 = vcmp.eq.f32.partialorder %v933_v38, 8.507059e+37 }
 0x1a1   : > { %v1126_v12 = vpop.f32.mrf.mxu3 }
 0x1a2   : > { %v1636_v28 = vpop.eup %1635 }
 0x1a3   : > { %v1638_v29 = vpop.eup %1637  ;;  %v923_v31 = vadd.f32 1.0, %v1636_v28 }
 0x1a4   : > { %v925_v32 = vmul.f32 %v1638_v29, %v922_v27  ;;  %vm930_vm11 = vweird.f32 %v1638_v29 }
 0x1a5   : > { %1639 = vrcp.f32 %v923_v31  ;;  %vm931_vm14 = vmor %vm929_vm13, %vm930_vm11  ;;  %v950_v40 = vand.u32 2147483648, %v923_v31  ;;  %v948_v43 = vand.u32 2147483647, %v923_v31  ;;  %vm944_vm2 = vweird.f32 %v923_v31 }
 0x1a6   : > { %v926_v33 = vsub.f32 1.0, %v925_v32 }
 0x1a7   : > { %v951_v47 = vor.u32 1.1754944e-38, %v950_v40  ;;  %vm949_vm4 = vcmp.eq.f32.partialorder %v948_v43, 8.507059e+37 }
 0x1a8   : > { %v927_v34 = vmul.f32 %v1638_v29, %v926_v33 }
 0x1aa   : > { %v928_v22 = vadd.f32 %v1638_v29, %v927_v34 }
 0x1ab   : > { %v1640_v35 = vpop.eup %1639 }
 0x1ac   : > { %v940_v36 = vmul.f32 %v1640_v35, %v923_v31  ;;  %v932_v41 = vsel %vm931_vm14, %v1638_v29, %v928_v22  ;;  %vm945_vm15 = vweird.f32 %v1640_v35 }
 0x1ad   : > { %v937_v46 = vsel %vm934_vm0, %v936_v44, %v932_v41  ;;  %vm946_vm3 = vmor %vm944_vm2, %vm945_vm15 }
 0x1ae   : > { %v941_v39 = vsub.f32 1.0, %v940_v36  ;;  %v954_v50 = vmul.f32 %v937_v46, %v2076_v53  ;;  %v1153_v53 = vld [vmem:[%s2200_s14] sm:$0x3] }
 0x1af   : > { %v1155_v30 = vperm.slane %v1153_v53, 0  ;;  %v1156_v7 = vperm.slane %v1153_v53, 1 }
 0x1b0   : > { %v942_v42 = vmul.f32 %v1640_v35, %v941_v39 }
 0x1b1   : > { %v1159_v2 = vadd.f32 %v1155_v30, %v1149_v61 }
 0x1b2   : > { %v943_v45 = vadd.f32 %v1640_v35, %v942_v42 }
 0x1b4   : > { %v947_v48 = vsel %vm946_vm3, %v1640_v35, %v943_v45 }
 0x1b5   : > { %v952_v49 = vsel %vm949_vm4, %v951_v47, %v947_v48  ;;  %v1188_v48 = vstv %s1468_s30  ;;  %s1672_s30 = scalar_lea.hbm %s1671_s26, 32 }
 0x1b6   : > { %v955_v51 = vmul.f32 %v952_v49, %v915_v20  ;;  %v1151_v20 = vmul.f32 %v1145_v56, %v1126_v12  ;;  %p1673_p0 = scmp.ne.s32.totalorder %s1671_s26, %s1672_s30  ;;  %p1678_p4 = scmp.lt.s32.totalorder %s1676_s27, %s1672_s30 }
 0x1b8   : > { %v956_v52 = vpack.c.bf16 %v955_v51, %v954_v50  ;;  %v1161_v29 = vadd.f32 %v1155_v30, %v1151_v20  ;;  %p1674_p1 = pnand %p1673_p0, %p1845_p5  ;;  %p1679_p7 = por %p1678_p4, %p1677_p3 }
 0x1ba   : > { %1430 = vmatmul.msk.bf16.vlgmr.msrb.gmra.mxu1 %vm1005_vm1, %v956_v52  ;;  %1431 = vmatmul.msk.bf16.vlgmr.msrb.gmra.mxu2 %vm1005_vm1, %v956_v52  ;;  %p1675_p2 = pneg %p1674_p1 }
 0x1bc   : > { %p1680_p8 = pnand %p1679_p7, %p1675_p2 }
 0x205   : > { %v1138_v3 = vpop.f32.mrf.mxu0 }
 0x206   : > { %v1150_v6 = vmul.f32 %v1146_v0, %v1138_v3 }
 0x208   : > { %v1160_v16 = vadd.f32 %v1156_v7, %v1150_v6 }
 0x20d   : > { %v1140_v28 = vpop.f32.mrf.mxu0 }
 0x20e   : > { %v1152_v35 = vmul.f32 %v1146_v0, %v1140_v28 }
 0x210   : > { %v1162_v45 = vadd.f32 %v1156_v7, %v1152_v35 }
 0x237   : > { %v1018_v62 = vpop.f32.mrf.mxu1 }
 0x238   : > { %v1043_v63 = vmul.f32 %v1039_v58, %v1018_v62 }
 0x23a   : > { %v1053_v1 = vadd.f32 %v1049_v60, %v1043_v63 }
 0x23c   : > { %v1057_v5 = vmax.f32 %v1053_v1, 0.0 }
 0x23d   : > { %v1032_v9 = vpop.f32.mrf.mxu2 }
 0x23e   : > { %v1163_v10 = vadd.f32 %v1159_v2, %v1057_v5  ;;  %v1044_v11 = vmul.f32 %v1040_v4, %v1032_v9 }
 0x23f   : > { %v1020_v14 = vpop.f32.mrf.mxu1 }
 0x240   : > { %v1170_v15 = vmax.f32 %v1163_v10, 0.0  ;;  %v1054_v17 = vadd.f32 %v1050_v8, %v1044_v11  ;;  %v1045_v18 = vmul.f32 %v1039_v58, %v1020_v14 }
 0x242   : > { %v1175_v21 = vmin.f32 %v1174_v13, %v1170_v15  ;;  %v1058_v23 = vmax.f32 %v1054_v17, 0.0  ;;  %v1055_v24 = vadd.f32 %v1049_v60, %v1045_v18 }
 0x244   : > { %v1180_v25 = vmul.f32 %v1179_v19, %v1175_v21  ;;  %v1164_v26 = vadd.f32 %v1160_v16, %v1058_v23  ;;  %v1059_v27 = vmax.f32 %v1055_v24, 0.0 }
 0x245   : > { %v1034_v31 = vpop.f32.mrf.mxu2 }
 0x246   : > { %v1535_v32 = vcvt.f32.s32 %v1180_v25  ;;  %v1171_v33 = vmax.f32 %v1164_v26, 0.0  ;;  %v1165_v34 = vadd.f32 %v1161_v29, %v1059_v27  ;;  %v1046_v22 = vmul.f32 %v1040_v4, %v1034_v31 }
 0x247   : > { %v1533_v38 = vand.u32 2147483647, %v1180_v25  ;;  %v1538_v42 = vand.u32 2147483648, %v1180_v25 }
 0x248   : > { %v1536_v36 = vcvt.s32.f32 %v1535_v32  ;;  %v1176_v37 = vmin.f32 %v1174_v13, %v1171_v33  ;;  %v1172_v39 = vmax.f32 %v1165_v34, 0.0  ;;  %v1056_v40 = vadd.f32 %v1050_v8, %v1046_v22 }
 0x249   : > { %vm1534_vm5 = vcmp.lt.f32.partialorder %v1533_v38, 8388608.0 }
 0x24a   : > { %v1537_v41 = vand.u32 2147483647, %v1536_v36  ;;  %v1181_v43 = vmul.f32 %v1179_v19, %v1176_v37  ;;  %v1177_v44 = vmin.f32 %v1174_v13, %v1172_v39  ;;  %v1060_v46 = vmax.f32 %v1056_v40, 0.0 }
 0x24c   : > { %v1539_v47 = vor.u32 %v1538_v42, %v1537_v41  ;;  %v1543_v49 = vcvt.f32.s32 %v1181_v43  ;;  %v1182_v50 = vmul.f32 %v1179_v19, %v1177_v44  ;;  %v1166_v51 = vadd.f32 %v1162_v45, %v1060_v46 }
 0x24d   : > { %v1541_v56 = vand.u32 2147483647, %v1181_v43  ;;  %v1546_v58 = vand.u32 2147483648, %v1181_v43 }
 0x24e   : > { %v1540_v52 = vsel %vm1534_vm5, %v1539_v47, %v1180_v25  ;;  %v1544_v54 = vcvt.s32.f32 %v1543_v49  ;;  %v1551_v57 = vcvt.f32.s32 %v1182_v50  ;;  %v1173_v59 = vmax.f32 %v1166_v51, 0.0 }
 0x24f   : > { %v1189_v55 = vmul.f32 %v1540_v52, %v1188_v48  ;;  %v1549_v30 = vand.u32 2147483647, %v1182_v50  ;;  %vm1542_vm6 = vcmp.lt.f32.partialorder %v1541_v56, 8388608.0  ;;  %v1554_v0 = vand.u32 2147483648, %v1182_v50 }
 0x250   : > { %v1545_v53 = vand.u32 2147483647, %v1544_v54  ;;  %v1552_v60 = vcvt.s32.f32 %v1551_v57  ;;  %v1178_v62 = vmin.f32 %v1174_v13, %v1173_v59 }
 0x251   : > { %1193 = vst [vmem:[%s2146_s0] sm:$0xff] %v1189_v55  ;;  %vm1550_vm7 = vcmp.lt.f32.partialorder %v1549_v30, 8388608.0 }
 0x252   : > { %v1547_v61 = vor.u32 %v1546_v58, %v1545_v53  ;;  %v1553_v63 = vand.u32 2147483647, %v1552_v60  ;;  %v1183_v2 = vmul.f32 %v1179_v19, %v1178_v62 }
 0x254   : > { %v1548_v1 = vsel %vm1542_vm6, %v1547_v61, %v1181_v43  ;;  %v1555_v4 = vor.u32 %v1554_v0, %v1553_v63  ;;  %v1559_v5 = vcvt.f32.s32 %v1183_v2  ;;  %v1557_v9 = vand.u32 2147483647, %v1183_v2 }
 0x255   : > { %v1190_v3 = vmul.f32 %v1548_v1, %v1188_v48  ;;  %v1562_v11 = vand.u32 2147483648, %v1183_v2 }
 0x256   : > { %v1556_v6 = vsel %vm1550_vm7, %v1555_v4, %v1182_v50  ;;  %v1560_v8 = vcvt.s32.f32 %v1559_v5  ;;  %vm1558_vm8 = vcmp.lt.f32.partialorder %v1557_v9, 8388608.0 }
 0x257   : > { %1194 = vst [vmem:[%s2146_s0 + $0x8] sm:$0xff] %v1190_v3  ;;  %v1191_v7 = vmul.f32 %v1556_v6, %v1188_v48 }
 0x258   : > { %v1561_v10 = vand.u32 2147483647, %v1560_v8 }
 0x259   : > { %1195 = vst [vmem:[%s2146_s0 + $0x10] sm:$0xff] %v1191_v7 }
 0x25a   : > { %v1563_v12 = vor.u32 %v1562_v11, %v1561_v10 }
 0x25c   : > { %v1564_v13 = vsel %vm1558_vm8, %v1563_v12, %v1183_v2 }
 0x25d   : > { %v1192_v14 = vmul.f32 %v1564_v13, %v1188_v48 }
 0x25f   : > { %1196 = vst [vmem:[%s2146_s0 + $0x18] sm:$0xff] %v1192_v14 }
 0x260   : > { %1683 = shalt.err (!%p1680_p8)
}
 0x261   : > { %s1725_s24 = smov 256   ;;  %s1726_s0 = smov 16  }
 0x262   : > { %1569 = dma.vmem_to_hbm [thread:$0]  (%p1845_p5), %s1211_s29, 512, %s1213_s25, %s1198_s22, %s1725_s24, %s1725_s24, %s1726_s0  }
 0x263 PF: > { %p1581_p9 = scmp.ge.s32.totalorder %s1722_s21, 2  ;;  %s1227_s16 = sand.u32 1, %s1710_s18  }
 0x264   : > { %s1228_s20 = scalar_lea.sflag [#allocation4], %s1227_s16 }
 0x265   : > { %p1576_p10 = pnand %p1581_p9, %p1849_p6 }
 0x267   : > { %p1577_p11 = pneg %p1576_p10 }
 0x269   : > { %1705 = dma.done.wait (%p1577_p11), %s1228_s20, 512  }
 0x26a   : > { %1707 = vsyncadd (%p1577_p11), %s1228_s20, 4294966784  ;;  %s2217_s21 = sld [smem:[#allocation10_spill]]  ;;  %s2220_s18 = smov %s1714_s19 }
 0x26b   : > { %s2218_s26 = sld [smem:[#allocation9_spill]] }
 0x26c   : > { %s2219_s20 = sld [smem:[#allocation11_spill]] }
 0x270   : > { %p26_p12 = scmp.ge.s32.totalorder %s2217_s21, 4  }
 0x271   : > { %s2221_s19 = smov %s2218_s26 }
 0x272   :  { %28 = sbr.rel (!%p26_p12) target bundleno = 7 (0x7), region = 125 }
 0x277   :  { %1234 = vsyncpa [#allocation4], 1 }
 0x278   :  { %1236 = vsyncpa [#allocation4 + $0x1], 1 }
 0x279   :  { %1237 = vsyncpa [#allocation5], 1 }
 0x27a   :  { %1239 = vsyncpa [#allocation5 + $0x1], 1 }

</bundles_post_ra>
